<compile_context>
chip_gen: v7x
topology: tpu7x:2x2x1
jax: 0.10.0
libtpu: 0.0.40
codegen_flags: <defaults>
</compile_context>

<pallas_src>
import numpy as np
import jax
import jax.numpy as jnp
from jax import lax
from jax.experimental import pallas as pl
from jax.experimental.pallas import tpu as pltpu


def _round_up(x, m):
    return ((x + m - 1) // m) * m


# ---------------------------------------------------------------------------
# Pallas kernel: patch-rows GEMM   (M, K) @ (K, E) + bias  ->  (M, E)
# ---------------------------------------------------------------------------

def _patch_embed_matmul_kernel(p_ref, w_ref, b_ref, o_ref):
    # One M-tile: (tm, K) @ (K, E) on the MXU, f32 accumulate, bias add in f32.
    acc = jnp.dot(p_ref[...], w_ref[...], preferred_element_type=jnp.float32)
    o_ref[...] = (acc + b_ref[...]).astype(o_ref.dtype)


def _vmem_block_bytes(tm, K, E, in_itemsize, out_itemsize):
    """Double-buffered VMEM footprint, counting lane padding to 128 lanes
    (and sublane padding to 8) -- the real footprint, not the raw bytes."""
    lane = lambda n: _round_up(n, 128)
    sub = lambda n: _round_up(n, 8)
    patches = 2 * tm * lane(K) * in_itemsize          # input M-tile, double-buffered
    weight = 2 * sub(K) * lane(E) * in_itemsize       # VMEM-resident weight
    bias = 2 * 8 * lane(E) * 4                        # f32 bias row
    out = 2 * tm * lane(E) * out_itemsize             # output M-tile
    return patches + weight + bias + out


# Conservative across chips: v7x has only 64 MiB physical VMEM per TensorCore.
_VMEM_BLOCK_BUDGET = 32 * 1024 * 1024


def patch_embed_matmul(patches, weight, bias, *, out_dtype, block_m=8192):
    """patches: (M, K), weight: (K, E), bias: (E,) -> (M, E).

    Memory-bound GEMM: large M tiles, VMEM-resident weight, M axis marked
    "parallel" (megacore on v7x), output written at its natural width E
    (no lane padding, no post-call slice).  K stays unpadded on purpose.
    """
    M, K = patches.shape
    Kw, E = weight.shape
    assert Kw == K
    assert bias.shape == (E,)

    in_itemsize = patches.dtype.itemsize
    out_itemsize = np.dtype(out_dtype).itemsize

    # --- choose the M tile ---------------------------------------------------
    block_m = max(256, _round_up(int(block_m), 256))
    # Keep grid_m >= 2 whenever M is large enough (megacore on v7x needs >= 2
    # grid steps along the "parallel" axis).
    tm = min(block_m, _round_up(pl.cdiv(M, 2), 256))
    if tm >= M:
        tm = M  # tiny problem: one full-extent block
    # Shrink until the double-buffered blocks fit the VMEM budget.
    while tm > 256 and _vmem_block_bytes(tm, K, E, in_itemsize, out_itemsize) > _VMEM_BLOCK_BUDGET:
        tm = max(256, _round_up(tm // 2, 256))
    grid_m = pl.cdiv(M, tm)

    est = _vmem_block_bytes(tm, K, E, in_itemsize, out_itemsize)
    vmem_limit = int(max(est + (4 << 20), 32 << 20))   # >= default; explicit for v5e

    bias2d = bias.reshape(1, E).astype(jnp.float32)

    cost = pl.CostEstimate(
        flops=2 * M * K * E,
        transcendentals=0,
        bytes_accessed=int(patches.size * in_itemsize
                           + weight.size * weight.dtype.itemsize
                           + bias2d.size * 4
                           + M * E * out_itemsize),
    )

    return pl.pallas_call(
        _patch_embed_matmul_kernel,
        out_shape=jax.ShapeDtypeStruct((M, E), out_dtype),
        grid_spec=pltpu.PrefetchScalarGridSpec(
            num_scalar_prefetch=0,
            grid=(grid_m,),
            in_specs=[
                pl.BlockSpec((tm, K), lambda i: (i, 0)),   # patch rows, tiled over M
                pl.BlockSpec((K, E), lambda i: (0, 0)),    # weight: VMEM-resident
                pl.BlockSpec((1, E), lambda i: (0, 0)),    # bias (f32)
            ],
            out_specs=pl.BlockSpec((tm, E), lambda i: (i, 0)),
        ),
        compiler_params=pltpu.CompilerParams(
            dimension_semantics=("parallel",),   # shard M across TCs on v7x
            vmem_limit_bytes=vmem_limit,
        ),
        cost_estimate=cost,
    )(patches, weight, bias2d)


def patch_embed_forward(x, conv_weight, conv_bias, patch_size, *,
                        compute_dtype=None, out_dtype=None, block_m=8192):
    """Swin PatchEmbed projection (nn.Conv2d(C, E, k=patch, stride=patch) after F.pad).

    x:             (N, C, H, W)  NCHW, matching PyTorch
    conv_weight:   (E, C, ph, pw)
    conv_bias:     (E,)
    compute_dtype: optional GEMM-input dtype (e.g. jnp.bfloat16); accumulation
                   stays f32.  x is cast BEFORE the patch-extraction transpose.
    out_dtype:     optional output dtype (e.g. jnp.bfloat16) -- output writeback
                   is the dominant HBM stream, so bf16 output halves it.
    returns:       (N, Hp, Wp, E) channels-last (downstream Swin flattens to
                   (N, Hp*Wp, E); same values as the NCHW conv output).
    """
    ph, pw = patch_size
    N, C, H, W = x.shape
    E = conv_weight.shape[0]
    K = C * ph * pw
    if out_dtype is None:
        out_dtype = x.dtype

    # Cast activations first so every glue pass below moves half the bytes.
    if compute_dtype is not None:
        x = x.astype(compute_dtype)

    # Pad right/bottom so H, W are divisible by the patch size (matches F.pad).
    pad_h = (-H) % ph
    pad_w = (-W) % pw
    if pad_h or pad_w:
        x = jnp.pad(x, ((0, 0), (0, 0), (0, pad_h), (0, pad_w)))
    Hp = (H + pad_h) // ph
    Wp = (W + pad_w) // pw

    # Patch extraction (XLA glue): (N,C,Hp,ph,Wp,pw) -> (N,Hp,Wp,C,ph,pw) -> (M,K)
    # TODO(synk): fuse into the kernel via memory_space=pl.ANY + manual DMA to
    # drop two extra HBM passes over the input stream (in-VMEM sub-128-lane
    # shuffle not yet robust to lower).
    xp = x.reshape(N, C, Hp, ph, Wp, pw).transpose(0, 2, 4, 1, 3, 5)
    patches = xp.reshape(N * Hp * Wp, K)

    # Conv weight as (K, E) with K ordering (C, ph, pw) to match the patches.
    w_mat = conv_weight.reshape(E, K).T
    if compute_dtype is not None:
        w_mat = w_mat.astype(compute_dtype)

    out = patch_embed_matmul(patches, w_mat, conv_bias,
                             out_dtype=out_dtype, block_m=block_m)  # (M, E)
    return out.reshape(N, Hp, Wp, E)


def _reference(x, conv_weight, conv_bias, patch_size):
    """NHWC reference via a strided conv (same semantics as nn.Conv2d + F.pad)."""
    ph, pw = patch_size
    N, C, H, W = x.shape
    pad_h = (-H) % ph
    pad_w = (-W) % pw
    if pad_h or pad_w:
        x = jnp.pad(x, ((0, 0), (0, 0), (0, pad_h), (0, pad_w)))
    E = conv_weight.shape[0]
    ref = lax.conv_general_dilated(
        x, conv_weight,
        window_strides=patch_size, padding="VALID",
        dimension_numbers=("NCHW", "OIHW", "NCHW"),
    ) + conv_bias.reshape(1, E, 1, 1)
    return jnp.transpose(ref, (0, 2, 3, 1))  # -> (N, Hp, Wp, E)


# ---------------------------------------------------------------------------
# BasicLayer forward-pass semantics (the spec module).
# ---------------------------------------------------------------------------

def window_partition_np(x, window_size):
    """NumPy mirror of the PyTorch window_partition helper."""
    B, H, W, C = x.shape
    x = x.reshape(B, H // window_size, window_size, W // window_size, window_size, C)
    return x.transpose(0, 1, 3, 2, 4, 5).reshape(-1, window_size, window_size, C)


def build_shift_attn_mask(H, W, window_size):
    """Shifted-window attention mask, exactly mirroring BasicLayer.forward.
    All inputs are static Python ints and the result is a compile-time
    constant, so plain NumPy suffices (no kernel needed)."""
    shift = window_size // 2
    Hp = int(np.ceil(H / window_size)) * window_size
    Wp = int(np.ceil(W / window_size)) * window_size
    img_mask = np.zeros((1, Hp, Wp, 1), dtype=np.float32)
    slices = (slice(0, -window_size), slice(-window_size, -shift), slice(-shift, None))
    cnt = 0
    for h in slices:
        for w in slices:
            img_mask[:, h, w, :] = cnt
            cnt += 1
    mw = window_partition_np(img_mask, window_size).reshape(-1, window_size * window_size)
    diff = mw[:, None, :] - mw[:, :, None]
    attn_mask = np.where(diff != 0, np.float32(-100.0), np.float32(0.0))
    return jnp.asarray(attn_mask)


def basic_layer_forward(x, H, W, window_size):
    """BasicLayer.forward semantics.

    TODO(synk): the constructor-injected transformer `block`s (attn_type /
    ffn_type variants) and the optional `downsample` module are not defined in
    the spec; no block transform is applied (x passes through) and the
    downsample=None branch is taken, returning (x, H, W, x, H, W).
    """
    attn_mask = build_shift_attn_mask(H, W, window_size)  # consumed by the (absent) blocks
    nW = ((H + window_size - 1) // window_size) * ((W + window_size - 1) // window_size)
    assert attn_mask.shape == (nW, window_size * window_size, window_size * window_size)
    return x, H, W, x, H, W


if __name__ == "__main__":
    # Small deterministic config: batch=2, in_chans=4, H=W=16, patch=4, embed_dim=32.
    N, C, H, W = 2, 4, 16, 16
    patch_size = (4, 4)
    embed_dim = 32

    key = jax.random.PRNGKey(0)
    kx, kw, kb, kx2, kfeat = jax.random.split(key, 5)
    x = jax.random.normal(kx, (N, C, H, W), dtype=jnp.float32)
    conv_weight = (
        jax.random.normal(kw, (embed_dim, C, patch_size[0], patch_size[1]),
                          dtype=jnp.float32) * 0.02
    )
    conv_bias = jax.random.normal(kb, (embed_dim,), dtype=jnp.float32) * 0.02

    # f32 path (strict parity).
    out = patch_embed_forward(x, conv_weight, conv_bias, patch_size)
    out = jax.block_until_ready(out)
    ref = _reference(x, conv_weight, conv_bias, patch_size)
    assert out.shape == (N, H // patch_size[0], W // patch_size[1], embed_dim)
    assert jnp.allclose(out, ref, atol=1e-4, rtol=1e-4)

    # bf16 compute + bf16 output (halves the dominant HBM streams), looser tol.
    out_bf16 = patch_embed_forward(x, conv_weight, conv_bias, patch_size,
                                   compute_dtype=jnp.bfloat16,
                                   out_dtype=jnp.bfloat16)
    out_bf16 = jax.block_until_ready(out_bf16)
    assert out_bf16.dtype == jnp.bfloat16
    assert jnp.allclose(out_bf16.astype(jnp.float32), ref, atol=5e-2, rtol=5e-2)

    # Non-divisible spatial size exercises the F.pad-equivalent path.
    x2 = jax.random.normal(kx2, (N, C, 14, 14), dtype=jnp.float32)
    out2 = patch_embed_forward(x2, conv_weight, conv_bias, patch_size)
    out2 = jax.block_until_ready(out2)
    ref2 = _reference(x2, conv_weight, conv_bias, patch_size)
    assert out2.shape == (N, 4, 4, embed_dim)
    assert jnp.allclose(out2, ref2, atol=1e-4, rtol=1e-4)

    # BasicLayer forward semantics: shifted-window attn_mask + passthrough tuple.
    attn_mask = build_shift_attn_mask(8, 8, 4)
    assert attn_mask.shape == (4, 16, 16)
    assert set(np.unique(np.asarray(attn_mask)).tolist()) <= {-100.0, 0.0}
    feat = jax.random.normal(kfeat, (N, 8 * 8, 32), dtype=jnp.float32)
    x_out, H_out, W_out, x_down, Wh_out, Ww_out = basic_layer_forward(feat, 8, 8, 4)
    x_out = jax.block_until_ready(x_out)
    assert x_out.shape == feat.shape
    assert (H_out, W_out, Wh_out, Ww_out) == (8, 8, 8, 8)

    print("KERNEL_OK")
</pallas_src>

<mosaic_0001>
module attributes {stable_mosaic.version = 11 : i64} {
  func.func @_patch_embed_matmul_kernel(%arg0: i32, %arg1: memref<32x64xf32, #tpu.memory_space<vmem>>, %arg2: memref<64x32xf32, #tpu.memory_space<vmem>>, %arg3: memref<1x32xf32, #tpu.memory_space<vmem>>, %arg4: memref<32x32xf32, #tpu.memory_space<vmem>>) attributes {dimension_semantics = [#tpu.dimension_semantics<parallel>], iteration_bounds = array<i64: 1>, scalar_prefetch = 0 : i64, scratch_operands = 0 : i64, tpu.core_type = #tpu.core_type<tc>, window_params = [{transform_indices = @transform_0, window_bounds = array<i64: 32, 64>}, {pipeline_mode = #tpu.pipeline_mode<synchronous>, transform_indices = @transform_1, window_bounds = array<i64: 64, 32>}, {pipeline_mode = #tpu.pipeline_mode<synchronous>, transform_indices = @transform_2, window_bounds = array<i64: 1, 32>}, {transform_indices = @transform_3, window_bounds = array<i64: 32, 32>}]} {
    %c0 = arith.constant 0 : index
    %c0_0 = arith.constant 0 : index
    %0 = vector.load %arg1[%c0, %c0_0] : memref<32x64xf32, #tpu.memory_space<vmem>>, vector<32x64xf32>
    %c0_1 = arith.constant 0 : index
    %c0_2 = arith.constant 0 : index
    %1 = vector.load %arg2[%c0_1, %c0_2] : memref<64x32xf32, #tpu.memory_space<vmem>>, vector<64x32xf32>
    %cst = arith.constant dense<0.000000e+00> : vector<32x32xf32>
    %2 = tpu.matmul %0, %1, %cst {dimension_numbers = #tpu.dot_dimension_numbers<[1], [0], [0], [1], [0, 0, 1, 1], [], []>} : vector<32x64xf32>, vector<64x32xf32>, vector<32x32xf32> -> vector<32x32xf32>
    %c0_3 = arith.constant 0 : index
    %c0_4 = arith.constant 0 : index
    %3 = vector.load %arg3[%c0_3, %c0_4] : memref<1x32xf32, #tpu.memory_space<vmem>>, vector<1x32xf32>
    %4 = vector.broadcast %3 : vector<1x32xf32> to vector<32x32xf32>
    %5 = arith.addf %2, %4 : vector<32x32xf32>
    %c0_5 = arith.constant 0 : index
    %c0_6 = arith.constant 0 : index
    %6 = vector.load %arg4[%c0_5, %c0_6] : memref<32x32xf32, #tpu.memory_space<vmem>>, vector<32x32xf32>
    tpu.vector_store %arg4[%c0_5, %c0_6], %5 {strides = array<i32>} : memref<32x32xf32, #tpu.memory_space<vmem>>, vector<32x32xf32>,
    return
  }
  func.func @transform_0(%arg0: i32) -> (i32, i32) {
    %c0_i32 = arith.constant 0 : i32
    %c0_i32_0 = arith.constant 0 : i32
    return %arg0, %c0_i32 : i32, i32
  }
  func.func @transform_1(%arg0: i32) -> (i32, i32) {
    %c0_i32 = arith.constant 0 : i32
    %c0_i32_0 = arith.constant 0 : i32
    %c0_i32_1 = arith.constant 0 : i32
    return %c0_i32, %c0_i32_0 : i32, i32
  }
  func.func @transform_2(%arg0: i32) -> (i32, i32) {
    %c0_i32 = arith.constant 0 : i32
    %c0_i32_0 = arith.constant 0 : i32
    %c0_i32_1 = arith.constant 0 : i32
    return %c0_i32, %c0_i32_0 : i32, i32
  }
  func.func @transform_3(%arg0: i32) -> (i32, i32) {
    %c0_i32 = arith.constant 0 : i32
    %c0_i32_0 = arith.constant 0 : i32
    return %arg0, %c0_i32 : i32, i32
  }
}

</mosaic_0001>

<bundles_post_ra>
// kernel: tpu_custom_call.1
= control target key start
LH: loop header
LB: loop body
LE: loop exit
PB: predicated region body
PF: predicated region fallthrough
CT: control target
= control target key end

     0   :  { %vm34_vm0 = vcmask 523264   ;;  %s321_s0 = inlined_call_operand.vmem [shape: f32[32,64], index: 0, kind: input, shape index: {}]   ;;  %s322_s1 = inlined_call_operand.vmem [shape: f32[64,32], index: 1, kind: input, shape index: {}]   ;;  %s323_s2 = inlined_call_operand.vmem [shape: f32[1,32], index: 2, kind: input, shape index: {}]   ;;  %s324_s3 = inlined_call_operand.hbm [shape: f32[32,32], index: 3, kind: output, shape index: {}]  }
   0x1   :  { %v19_v0 = vld [vmem:[%s322_s1] sm:$0xff]  ;;  %v20_v1 = vld [vmem:[%s322_s1 + $0x8] sm:$0xff]  ;;  %v21_v2 = vld [vmem:[%s322_s1 + $0x10] sm:$0xff] }
   0x2   :  { %v192_v3 = vpack.c.bf16 %v20_v1, %v19_v0  ;;  %v22_v4 = vld [vmem:[%s322_s1 + $0x18] sm:$0xff]  ;;  %v23_v6 = vld [vmem:[%s322_s1 + $0x20] sm:$0xff]  ;;  %v24_v7 = vld [vmem:[%s322_s1 + $0x28] sm:$0xff] }
   0x3   :  { %v196_v5 = vpack.c.bf16 %v22_v4, %v21_v2  ;;  %v15_v8 = vld [vmem:[%s321_s0] sm:$0xff]  ;;  %v17_v9 = vld [vmem:[%s321_s0 + $0x10] sm:$0xff] }
   0x4   :  { %193 = vmatprep.subr.bf16.mxu0 %v192_v3  ;;  %208 = vmatprep.subr.bf16.mxu1 %v192_v3 }
   0x5   :  { %195 = vmatpush3.bf16.msra.mxu0 %v192_v3  ;;  %212 = vmatpush3.bf16.msra.mxu1 %v192_v3 }
   0x6   :  { %8 = vsyncpa [#allocation3], 0  ;;  %197 = vmatprep.subr.bf16.mxu0 %v196_v5  ;;  %209 = vmatprep.subr.bf16.mxu1 %v196_v5  ;;  %v200_v10 = vpack.c.bf16 %v24_v7, %v23_v6  ;;  %v25_v11 = vld [vmem:[%s322_s1 + $0x30] sm:$0xff]  ;;  %v26_v12 = vld [vmem:[%s322_s1 + $0x38] sm:$0xff]  ;;  %s243_s10 = smov [#allocation2]   ;;  %vm132_vm1 = vcmask 261120  }
   0x7   :  { %186 = vmatprep.mubr.msk.f32.mxu0 %vm34_vm0, %v15_v8  ;;  %189 = vmatprep.mubr.msk.f32.mxu1 %vm34_vm0, %v17_v9  ;;  %v204_v13 = vpack.c.bf16 %v26_v12, %v25_v11  ;;  %v16_v14 = vld [vmem:[%s321_s0 + $0x8] sm:$0xff]  ;;  %v18_v15 = vld [vmem:[%s321_s0 + $0x18] sm:$0xff]  ;;  %v153_v16 = vld [vmem:[%s323_s2] ss:$0 sm:$0xff]  ;;  %s142_s11 = sshll.u32 %s243_s10, 4  ;;  %s143_s11 = int_to_ptr.vmem [resolvable:$true] %s142_s11 }
   0x8   :  { %s219_s0 = scalar_lea.vmem %s143_s11, 512  ;;  %p224_p1 = scmp.lt.s32.totalorder %s143_s11, %s143_s11 }
   0x9   :  { %199 = vmatpush3.bf16.msra.mxu0 %v196_v5  ;;  %213 = vmatpush3.bf16.msra.mxu1 %v196_v5  ;;  %p220_p0 = scmp.ne.s32.totalorder %s143_s11, %s219_s0  ;;  %p225_p2 = scmp.lt.s32.totalorder %s219_s0, %s219_s0 }
   0xa   :  { %201 = vmatprep.subr.bf16.mxu0 %v200_v10  ;;  %210 = vmatprep.subr.bf16.mxu1 %v200_v10 }
   0xb   :  { %p226_p3 = por %p225_p2, %p224_p1 }
   0xd   :  { %203 = vmatpush3.bf16.msra.mxu0 %v200_v10  ;;  %214 = vmatpush3.bf16.msra.mxu1 %v200_v10  ;;  %p227_p4 = pnand %p226_p3, %p220_p0 }
   0xe   :  { %205 = vmatprep.subr.bf16.mxu0 %v204_v13  ;;  %211 = vmatprep.subr.bf16.mxu1 %v204_v13 }
  0x11   :  { %207 = vmatpush3.bf16.msra.mxu0 %v204_v13  ;;  %215 = vmatpush3.bf16.msra.mxu1 %v204_v13 }
  0x14   :  { %187 = vmatmul.mubr.msk.f32.vlgmr.msra.gmra.mrb[0].mxu0 %vm34_vm0, %v16_v14  ;;  %190 = vmatmul.mubr.msk.f32.vlgmr.msra.gmra.mrb[0].mxu1 %vm34_vm0, %v18_v15 }
  0xe7   :  { %v188_v17 = vpop.f32.mrb[0].mxu0  ;;  %v191_v18 = vpop.f32.mrb[0].mxu1 }
  0xe8   :  { %v119_v19 = vadd.f32 %v188_v17, %v153_v16  ;;  %v129_v20 = vadd.f32 %v191_v18, %v153_v16  ;;  %v113_v21 = vpop.f32.mrb[1].mxu0  ;;  %v123_v22 = vpop.f32.mrb[1].mxu1 }
  0xe9   :  { %v114_v23 = vadd.f32 %v153_v16, %v113_v21  ;;  %v124_v24 = vadd.f32 %v153_v16, %v123_v22 }
  0xea   :  { %134 = vst.msk [vmem:[#allocation2 + $0x8] sm:$0xff] %vm132_vm1, %v119_v19  ;;  %136 = vst.msk [vmem:[#allocation2 + $0x18] sm:$0xff] %vm132_vm1, %v129_v20 }
  0xeb   :  { %133 = vst.msk [vmem:[#allocation2] sm:$0xff] %vm132_vm1, %v114_v23  ;;  %135 = vst.msk [vmem:[#allocation2 + $0x10] sm:$0xff] %vm132_vm1, %v124_v24 }
  0xec   :  { %230 = shalt.err (!%p227_p4)
}
  0xed   :  { %s231_s13 = scalar_lea.hbm %s324_s3, 512 }
  0xee   :  { %p232_p5 = scmp.ne.s32.totalorder %s324_s3, %s231_s13  ;;  %p235_p6 = scmp.lt.u32.totalorder %s231_s13, %s324_s3 }
  0xf0   :  { %p237_p7 = pnand %p235_p6, %p232_p5 }
  0xf2   :  { %240 = shalt.err (!%p237_p7)
}
  0xf3   :  { %s244_s18 = smov 128   ;;  %s245_s19 = smov 8  }
  0xf4   :  { %148 = dma.vmem_to_hbm [thread:$0]  %s143_s11, 512, %s324_s3, [#allocation3], %s244_s18, %s244_s18, %s245_s19  }
  0xf5   :  { %241 = dma.done.wait [#allocation3], 512  }
  0xf6   :  { %242 = vsyncadd [#allocation3], 4294966784 }
  0xf7   :  { %152 = vsyncpa [#allocation3], 1 }

</bundles_post_ra>
